<compile_context>
chip_gen: v7x
topology: tpu7x:2x2x1
jax: 0.10.0
libtpu: 0.0.40
codegen_flags: <defaults>
</compile_context>

<pallas_src>
import jax
import jax.numpy as jnp
from jax import lax
from jax.experimental import pallas as pl
from jax.experimental.pallas import tpu as pltpu


def _round_up(x, m):
    return ((x + m - 1) // m) * m


def edge_decoder_kernel(zp_ref, zl_ref, w_ref, b_ref, o_ref):
    # zp_ref, zl_ref: (TN, D) VMEM tiles in the inputs' native dtype
    # w_ref:          (1, D)  VMEM row (same block every grid step), f32
    # b_ref:          (1, 1)  SMEM scalar, f32
    # o_ref:          (1, TN) VMEM output tile (lane-dense)
    x = zp_ref[...].astype(jnp.float32) * zl_ref[...].astype(jnp.float32)  # VPU
    # (1, D) . (TN, D) contracted over D -> (1, TN): lane-dense output block.
    proj = lax.dot_general(
        w_ref[...], x,
        dimension_numbers=(((1,), (1,)), ((), ())),
        preferred_element_type=jnp.float32,
    )
    o_ref[...] = (proj + b_ref[0, 0]).astype(o_ref.dtype)


def edge_decoder(z_paper, z_label, weight, bias, *, tile_n=512):
    """z_paper, z_label: [N, D]; weight: [1, D] (PyTorch layout); bias: [1]."""
    N, D = z_paper.shape
    assert z_label.shape == (N, D)

    # Row tile: large by default, clamped for small N; ragged N handled by
    # padding in the wrapper (padded rows are sliced off afterwards).
    tile = min(int(tile_n), _round_up(N, 8))
    tile = max(8, _round_up(tile, 8))
    n_pad = _round_up(N, tile)
    if n_pad > tile:
        # Multiple blocks along the lane-dense output axis -> tile must be a
        # multiple of 128 to satisfy the (8, 128) blocking constraint.
        tile = _round_up(tile, 128)
        n_pad = _round_up(N, tile)

    if n_pad != N:
        pad = n_pad - N
        z_paper = jnp.pad(z_paper, ((0, pad), (0, 0)))
        z_label = jnp.pad(z_label, ((0, pad), (0, 0)))

    w_row = weight.reshape(1, D).astype(jnp.float32)   # (1, D) lane-dense row
    b_smem = bias.reshape(1, 1).astype(jnp.float32)    # scalar in SMEM

    out2d = pl.pallas_call(
        edge_decoder_kernel,
        out_shape=jax.ShapeDtypeStruct((1, n_pad), jnp.float32),
        grid_spec=pltpu.PrefetchScalarGridSpec(
            num_scalar_prefetch=0,
            grid=(n_pad // tile,),
            in_specs=[
                pl.BlockSpec((tile, D), lambda i: (i, 0)),   # z_paper (native dtype)
                pl.BlockSpec((tile, D), lambda i: (i, 0)),   # z_label (native dtype)
                pl.BlockSpec((1, D), lambda i: (0, 0)),      # weight row
                pl.BlockSpec(memory_space=pltpu.SMEM),       # bias scalar
            ],
            out_specs=pl.BlockSpec((1, tile), lambda i: (0, i)),
        ),
        compiler_params=pltpu.CompilerParams(
            dimension_semantics=("parallel",),
            vmem_limit_bytes=64 * 1024 * 1024,
        ),
    )(z_paper, z_label, w_row, b_smem)

    return out2d.reshape(n_pad)[:N]   # squeeze(-1) -> [N]


def reference(z_paper, z_label, weight, bias):
    x = z_paper.astype(jnp.float32) * z_label.astype(jnp.float32)
    return x @ weight.reshape(-1).astype(jnp.float32) + bias.astype(jnp.float32)[0]


if __name__ == "__main__":
    key = jax.random.PRNGKey(0)
    k1, k2, k3, k4, k5, k6 = jax.random.split(key, 6)

    # Small shapes consistent with the module: 8 candidate edges, embedding_size = 32.
    N, D = 8, 32
    z_paper = jax.random.normal(k1, (N, D), dtype=jnp.float32)
    z_label = jax.random.normal(k2, (N, D), dtype=jnp.float32)

    # Deterministic Linear(D, 1) params (PyTorch-style uniform(-1/sqrt(D), 1/sqrt(D))).
    bound = 1.0 / (D ** 0.5)
    weight = jax.random.uniform(k3, (1, D), minval=-bound, maxval=bound, dtype=jnp.float32)
    bias = jax.random.uniform(k4, (1,), minval=-bound, maxval=bound, dtype=jnp.float32)

    out = edge_decoder(z_paper, z_label, weight, bias)
    out = jax.block_until_ready(out)
    ref = reference(z_paper, z_label, weight, bias)
    assert out.shape == (N,)
    assert jnp.allclose(out, ref, atol=1e-5, rtol=1e-5), (out, ref)

    # Second check: ragged N with multiple row tiles (exercises padding + grid).
    N2 = 300
    zp2 = jax.random.normal(k5, (N2, D), dtype=jnp.float32)
    zl2 = jax.random.normal(k6, (N2, D), dtype=jnp.float32)
    out2 = edge_decoder(zp2, zl2, weight, bias, tile_n=128)
    out2 = jax.block_until_ready(out2)
    ref2 = reference(zp2, zl2, weight, bias)
    assert out2.shape == (N2,)
    assert jnp.allclose(out2, ref2, atol=1e-5, rtol=1e-5), (out2, ref2)

    print("KERNEL_OK")
</pallas_src>

<mosaic_0001>
module attributes {stable_mosaic.version = 11 : i64} {
  func.func @edge_decoder_kernel(%arg0: i32, %arg1: memref<8x32xf32, #tpu.memory_space<vmem>>, %arg2: memref<8x32xf32, #tpu.memory_space<vmem>>, %arg3: memref<1x32xf32, #tpu.memory_space<vmem>>, %arg4: memref<1x1xf32, #tpu.memory_space<smem>>, %arg5: memref<1x8xf32, #tpu.memory_space<vmem>>) attributes {dimension_semantics = [#tpu.dimension_semantics<parallel>], iteration_bounds = array<i64: 1>, scalar_prefetch = 0 : i64, scratch_operands = 0 : i64, tpu.core_type = #tpu.core_type<tc>, window_params = [{transform_indices = @transform_0, window_bounds = array<i64: 8, 32>}, {transform_indices = @transform_1, window_bounds = array<i64: 8, 32>}, {pipeline_mode = #tpu.pipeline_mode<synchronous>, transform_indices = @transform_2, window_bounds = array<i64: 1, 32>}, {transform_indices = @transform_3, window_bounds = array<i64: 1, 1>}, {transform_indices = @transform_4, window_bounds = array<i64: 1, 8>}]} {
    %c0 = arith.constant 0 : index
    %c0_0 = arith.constant 0 : index
    %0 = vector.load %arg1[%c0, %c0_0] : memref<8x32xf32, #tpu.memory_space<vmem>>, vector<8x32xf32>
    %c0_1 = arith.constant 0 : index
    %c0_2 = arith.constant 0 : index
    %1 = vector.load %arg2[%c0_1, %c0_2] : memref<8x32xf32, #tpu.memory_space<vmem>>, vector<8x32xf32>
    %2 = arith.mulf %0, %1 : vector<8x32xf32>
    %c0_3 = arith.constant 0 : index
    %c0_4 = arith.constant 0 : index
    %3 = vector.load %arg3[%c0_3, %c0_4] : memref<1x32xf32, #tpu.memory_space<vmem>>, vector<1x32xf32>
    %cst = arith.constant dense<0.000000e+00> : vector<1x8xf32>
    %4 = tpu.matmul %3, %2, %cst {dimension_numbers = #tpu.dot_dimension_numbers<[1], [1], [0], [0], [0, 0, 1, 0], [], []>} : vector<1x32xf32>, vector<8x32xf32>, vector<1x8xf32> -> vector<1x8xf32>
    %c0_5 = arith.constant 0 : index
    %c0_6 = arith.constant 0 : index
    %5 = memref.load %arg4[%c0_5, %c0_6] : memref<1x1xf32, #tpu.memory_space<smem>>
    %6 = vector.broadcast %5 : f32 to vector<1x8xf32>
    %7 = arith.addf %4, %6 : vector<1x8xf32>
    %c0_7 = arith.constant 0 : index
    %c0_8 = arith.constant 0 : index
    %8 = vector.load %arg5[%c0_7, %c0_8] : memref<1x8xf32, #tpu.memory_space<vmem>>, vector<1x8xf32>
    tpu.vector_store %arg5[%c0_7, %c0_8], %7 {strides = array<i32>} : memref<1x8xf32, #tpu.memory_space<vmem>>, vector<1x8xf32>,
    return
  }
  func.func @transform_0(%arg0: i32) -> (i32, i32) {
    %c0_i32 = arith.constant 0 : i32
    %c0_i32_0 = arith.constant 0 : i32
    return %arg0, %c0_i32 : i32, i32
  }
  func.func @transform_1(%arg0: i32) -> (i32, i32) {
    %c0_i32 = arith.constant 0 : i32
    %c0_i32_0 = arith.constant 0 : i32
    return %arg0, %c0_i32 : i32, i32
  }
  func.func @transform_2(%arg0: i32) -> (i32, i32) {
    %c0_i32 = arith.constant 0 : i32
    %c0_i32_0 = arith.constant 0 : i32
    %c0_i32_1 = arith.constant 0 : i32
    return %c0_i32, %c0_i32_0 : i32, i32
  }
  func.func @transform_3(%arg0: i32) -> (i32, i32) {
    %c0_i32 = arith.constant 0 : i32
    %c0_i32_0 = arith.constant 0 : i32
    %c0_i32_1 = arith.constant 0 : i32
    return %c0_i32, %c0_i32_0 : i32, i32
  }
  func.func @transform_4(%arg0: i32) -> (i32, i32) {
    %c0_i32 = arith.constant 0 : i32
    %c0_i32_0 = arith.constant 0 : i32
    return %c0_i32, %arg0 : i32, i32
  }
}

</mosaic_0001>

<bundles_post_ra>
// kernel: tpu_custom_call.1
= control target key start
LH: loop header
LB: loop body
LE: loop exit
PB: predicated region body
PF: predicated region fallthrough
CT: control target
= control target key end

     0   :  { %10 = vsyncpa [#allocation4], 0  ;;  %s346_s0 = inlined_call_operand.hbm [shape: f32[8,32], index: 0, kind: input, shape index: {}]   ;;  %s347_s1 = inlined_call_operand.hbm [shape: f32[8,32], index: 1, kind: input, shape index: {}]   ;;  %s348_s2 = inlined_call_operand.hbm [shape: f32[1,32], index: 2, kind: input, shape index: {}]   ;;  %s349_s3 = inlined_call_operand.<no memory space> [shape: f32[1,1], index: 3, kind: input, shape index: {}]   ;;  %s350_s4 = inlined_call_operand.hbm [shape: f32[1,8], index: 4, kind: output, shape index: {}]  }
   0x1   :  { %11 = vsyncpa [#allocation7], 0 }
   0x2   :  { %12 = vsyncpa [#allocation5], 0  ;;  %s264_s15 = smov [#allocation6]   ;;  %s265_s17 = smov [#allocation3]  }
   0x3   :  { %s29_s16 = sshll.u32 %s264_s15, 4  ;;  %s19_s18 = sshll.u32 %s265_s17, 4  ;;  %s30_s16 = int_to_ptr.vmem [resolvable:$true] %s29_s16  ;;  %s20_s18 = int_to_ptr.vmem [resolvable:$true] %s19_s18 }
   0x4   :  { %s170_s21 = scalar_lea.hbm %s347_s1, 128 }
   0x5   :  { %p171_p0 = scmp.ne.s32.totalorder %s347_s1, %s170_s21  ;;  %p174_p1 = scmp.lt.u32.totalorder %s170_s21, %s347_s1 }
   0x7   :  { %p176_p2 = pnand %p174_p1, %p171_p0 }
   0x9   :  { %179 = shalt.err (!%p176_p2)
}
   0xa   :  { %s180_s26 = scalar_lea.vmem %s30_s16, 128  ;;  %p185_p4 = scmp.lt.s32.totalorder %s30_s16, %s30_s16 }
   0xb   :  { %p181_p3 = scmp.ne.s32.totalorder %s30_s16, %s180_s26  ;;  %p186_p5 = scmp.lt.s32.totalorder %s180_s26, %s180_s26 }
   0xd   :  { %p187_p6 = por %p186_p5, %p185_p4 }
   0xf   :  { %p188_p7 = pnand %p187_p6, %p181_p3 }
  0x11   :  { %191 = shalt.err (!%p188_p7)
}
  0x12   :  { %32 = dma.hbm_to_vmem [thread:$0]  %s347_s1, 128, %s30_s16, [#allocation7]  }
  0x13   :  { %s192_s5 = scalar_lea.hbm %s346_s0, 128 }
  0x14   :  { %p193_p8 = scmp.ne.s32.totalorder %s346_s0, %s192_s5  ;;  %p196_p9 = scmp.lt.u32.totalorder %s192_s5, %s346_s0 }
  0x16   :  { %p198_p10 = pnand %p196_p9, %p193_p8 }
  0x18   :  { %201 = shalt.err (!%p198_p10)
}
  0x19   :  { %s202_s10 = scalar_lea.vmem %s20_s18, 128  ;;  %p207_p12 = scmp.lt.s32.totalorder %s20_s18, %s20_s18 }
  0x1a   :  { %p203_p11 = scmp.ne.s32.totalorder %s20_s18, %s202_s10  ;;  %p208_p13 = scmp.lt.s32.totalorder %s202_s10, %s202_s10 }
  0x1c   :  { %p209_p0 = por %p208_p13, %p207_p12 }
  0x1e   :  { %p210_p1 = pnand %p209_p0, %p203_p11 }
  0x20   :  { %213 = shalt.err (!%p210_p1)
}
  0x21   :  { %22 = dma.hbm_to_vmem [thread:$0]  %s346_s0, 128, %s20_s18, [#allocation4]  }
  0x22   :  { %s266_s12 = smov [#allocation8]   ;;  %s214_s16 = scalar_lea.hbm %s348_s2, 16 }
  0x23   :  { %s39_s13 = sshll.u32 %s266_s12, 4  ;;  %p215_p2 = scmp.ne.s32.totalorder %s348_s2, %s214_s16  ;;  %s40_s13 = int_to_ptr.vmem [resolvable:$true] %s39_s13 }
  0x24   :  { %p218_p3 = scmp.lt.u32.totalorder %s214_s16, %s348_s2 }
  0x26   :  { %p220_p4 = pnand %p218_p3, %p215_p2 }
  0x28   :  { %223 = shalt.err (!%p220_p4)
}
  0x29   :  { %s224_s22 = scalar_lea.vmem %s40_s13, 16  ;;  %s228_s0 = scalar_lea.vmem %s40_s13, 32 }
  0x2a   :  { %p225_p5 = scmp.ne.s32.totalorder %s40_s13, %s224_s22  ;;  %p229_p6 = scmp.lt.s32.totalorder %s40_s13, %s40_s13 }
  0x2b   :  { %p230_p7 = scmp.lt.s32.totalorder %s228_s0, %s224_s22 }
  0x2d   :  { %p231_p8 = por %p230_p7, %p229_p6 }
  0x2f   :  { %p232_p9 = pnand %p231_p8, %p225_p5 }
  0x31   :  { %235 = shalt.err (!%p232_p9)
}
  0x32   :  { %42 = dma.hbm_to_vmem [thread:$0]  %s348_s2, 16, %s40_s13, [#allocation7]  }
  0x33   :  { %258 = dma.done.wait [#allocation4], 128  }
  0x34   :  { %259 = vsyncadd [#allocation4], 4294967168 }
  0x35   :  { %260 = dma.done.wait [#allocation7], 144  }
  0x36   :  { %261 = vsyncadd [#allocation7], 4294967152  ;;  %v267_v0 = vmov 0.0   ;;  %vm268_vm0 = vmmov 0   ;;  %v54_v1 = vld [vmem:[#allocation3] sm:$0xff]  ;;  %v55_v2 = vld [vmem:[#allocation6] sm:$0xff]  ;;  %v59_v5 = vstv %s349_s3 }
  0x37   :  { %159 = vmatprep.subr.mxu0 %v267_v0  ;;  %161 = vmatprep.mubr.msk.f32.mxu0 %vm268_vm0, %v267_v0  ;;  %vm60_vm1 = vcmask 261120   ;;  %v56_v3 = vmul.f32 %v55_v2, %v54_v1  ;;  %v57_v4 = vld [vmem:[#allocation8] sm:$0x1]  ;;  %s269_s2 = smov [#allocation9]   ;;  %vm137_vm2 = vcmask 57344  }
  0x38   :  { %s145_s26 = sshll.u32 %s269_s2, 4  ;;  %s146_s26 = int_to_ptr.vmem [resolvable:$true] %s145_s26 }
  0x39   :  { %160 = vmatpush3.xpose.msk.msra.mxu0 %vm60_vm1, %v56_v3  ;;  %s236_s27 = scalar_lea.vmem %s146_s26, 16  ;;  %s240_s28 = scalar_lea.vmem %s146_s26, 32 }
  0x3a   :  { %p237_p10 = scmp.ne.s32.totalorder %s146_s26, %s236_s27  ;;  %p241_p11 = scmp.lt.s32.totalorder %s146_s26, %s146_s26 }
  0x3b   :  { %p242_p12 = scmp.lt.s32.totalorder %s240_s28, %s236_s27 }
  0x3c   :  { %162 = vmatmul.mubr.msk.f32.vlgmr.msra.gmra.mrb[0].mxu0 %vm60_vm1, %v57_v4 }
  0x3d   :  { %p243_p13 = por %p242_p12, %p241_p11 }
  0x3f   :  { %p244_p0 = pnand %p243_p13, %p237_p10 }
 0x10f   :  { %v133_v6 = vpop.f32.mrb[0].mxu0 }
 0x110   :  { %v134_v7 = vadd.f32 %v133_v6, %v59_v5  ;;  %v163_v8 = vpop.f32.mrb[1].mxu0 }
 0x112   :  { %138 = vst.msk [vmem:[#allocation9] sm:$0x1] %vm137_vm2, %v134_v7 }
 0x113   :  { %247 = shalt.err (!%p244_p0)
}
 0x114   :  { %s248_s3 = scalar_lea.hbm %s350_s4, 16 }
 0x115   :  { %p249_p1 = scmp.ne.s32.totalorder %s350_s4, %s248_s3  ;;  %p252_p2 = scmp.lt.u32.totalorder %s248_s3, %s350_s4 }
 0x117   :  { %p254_p3 = pnand %p252_p2, %p249_p1 }
 0x119   :  { %257 = shalt.err (!%p254_p3)
}
 0x11a   :  { %148 = dma.vmem_to_hbm [thread:$0]  %s146_s26, 16, %s350_s4, [#allocation5]  }
 0x11b   :  { %262 = dma.done.wait [#allocation5], 16  }
 0x11c   :  { %263 = vsyncadd [#allocation5], 4294967280 }
 0x11d   :  { %152 = vsyncpa [#allocation4], 1 }
 0x11e   :  { %153 = vsyncpa [#allocation7], 1 }
 0x11f   :  { %154 = vsyncpa [#allocation5], 1 }

</bundles_post_ra>
